<compile_context>
chip_gen: v5e
topology: v5e:2x2
jax: 0.10.0
libtpu: 0.0.40
codegen_flags: <defaults>
</compile_context>

<pallas_src>
import functools

import jax
import jax.numpy as jnp
from jax.experimental import pallas as pl
from jax.experimental.pallas import tpu as pltpu


# -----------------------------------------------------------------------------
# Fused kernel: whole Up block for one batch element.
# Channels-first; spatial flattened row-major with width Ws (lane-dense).
# Columns with (p % Ws) beyond the valid width are garbage and sliced outside.
# -----------------------------------------------------------------------------
def _up_block_kernel(x_ref, skip_ref, wup_ref, bup_ref, scat_ref, w1_ref, w2_ref,
                     o_ref, cat_ref, col1_ref, h1_ref, col2_ref, *,
                     cs, cu, cin, cmid, ws, hw_s, l1, l2):
    f32 = jnp.float32

    # 1) ConvTranspose2d(k=2, s=2): a single MXU matmul yields all 4 (kh, kw) taps.
    #    up4 rows are ordered (kh*2 + kw)*Cu + cu.
    up4 = jnp.dot(wup_ref[...], x_ref[0], preferred_element_type=f32) + bup_ref[...]

    # 2) Stride-2 interleave + zero-pad to the skip spatial size via one-hot
    #    scatter matmuls (pad-border columns stay exactly 0).
    up_pad = jnp.dot(up4[:cu, :], scat_ref[0], preferred_element_type=f32)
    for a in range(1, 4):                                  # a = kh*2 + kw
        up_pad = up_pad + jnp.dot(up4[a * cu:(a + 1) * cu, :], scat_ref[a],
                                  preferred_element_type=f32)

    # 3) Channel concat [skip ; upsampled_padded] staged in VMEM (never hits HBM).
    cat_ref[:cs, :hw_s] = skip_ref[0]
    cat_ref[cs:, :hw_s] = up_pad.astype(cat_ref.dtype)
    cat_ref[:, hw_s:] = jnp.zeros((cin, 2), cat_ref.dtype)    # shift-headroom tail

    # 4) conv1 (3x3 valid, no bias) + ReLU: stacked im2col slab + ONE matmul.
    for kh in range(3):
        for kw in range(3):
            k = kh * 3 + kw
            s = kh * ws + kw
            col1_ref[k * cin:(k + 1) * cin, :] = cat_ref[:, s:s + l1]
    h1 = jnp.dot(w1_ref[...], col1_ref[...], preferred_element_type=f32)
    h1_ref[:, :l1] = jnp.maximum(h1, 0.0).astype(h1_ref.dtype)
    h1_ref[:, l1:] = jnp.zeros((cmid, 2), h1_ref.dtype)       # tail only (no full zero)

    # 5) conv2 (3x3 valid, no bias) + ReLU.
    for kh in range(3):
        for kw in range(3):
            k = kh * 3 + kw
            s = kh * ws + kw
            col2_ref[k * cmid:(k + 1) * cmid, :] = h1_ref[:, s:s + l2].astype(col2_ref.dtype)
    out = jnp.dot(w2_ref[...], col2_ref[...], preferred_element_type=f32)
    o_ref[0] = jnp.maximum(out, 0.0).astype(o_ref.dtype)


# -----------------------------------------------------------------------------
# One-time parameter preparation (hoisted out of the forward).
# -----------------------------------------------------------------------------
def prepare_up_params(params, x_spatial, skip_spatial, *, compute_dtype=jnp.float32):
    w_up, b_up, w1, w2 = params
    cin_x, cu = w_up.shape[0], w_up.shape[1]
    cmid, cout = w1.shape[0], w2.shape[0]
    H, W = x_spatial
    Hs, Ws = skip_spatial
    assert Hs >= 2 * H and Ws >= 2 * W

    # ConvT weight (ci, cu, kh, kw) -> rows (kh*2+kw)*Cu + cu, cols ci.
    wup_r = jnp.transpose(w_up, (2, 3, 1, 0)).reshape(4 * cu, cin_x).astype(compute_dtype)
    bup_r = jnp.tile(b_up, 4).reshape(4 * cu, 1).astype(jnp.float32)

    # One-hot scatter matrices: source (i, j) of tap (kh, kw) -> flattened
    # (2i+kh+padT)*Ws + (2j+kw+padL) on the padded, skip-sized grid.
    padT = (Hs - 2 * H) // 2
    padL = (Ws - 2 * W) // 2
    ii, jj = jnp.meshgrid(jnp.arange(H), jnp.arange(W), indexing="ij")
    q = (ii * W + jj).reshape(-1)
    scat = jnp.zeros((4, H * W, Hs * Ws), jnp.float32)
    for kh in range(2):
        for kw in range(2):
            p = ((2 * ii + kh + padT) * Ws + (2 * jj + kw + padL)).reshape(-1)
            scat = scat.at[kh * 2 + kw, q, p].set(1.0)

    # Conv weights (co, ci, kh, kw) -> column order (kh*3+kw)*C + ci.
    w1_r = jnp.transpose(w1, (0, 2, 3, 1)).reshape(cmid, -1).astype(compute_dtype)
    w2_r = jnp.transpose(w2, (0, 2, 3, 1)).reshape(cout, -1).astype(compute_dtype)
    return wup_r, bup_r, scat, w1_r, w2_r


# -----------------------------------------------------------------------------
# Forward (NCHW in / NCHW out, matching the PyTorch module).
# -----------------------------------------------------------------------------
def up_forward(x, skip, prepped, *, compute_dtype=jnp.float32):
    wup_r, bup_r, scat, w1_r, w2_r = prepped
    N, cin_x, H, W = x.shape
    _, cs, Hs, Ws = skip.shape
    cu = wup_r.shape[0] // 4
    cmid, cout = w1_r.shape[0], w2_r.shape[0]
    cin = cs + cu                                  # channels of the concat slab
    assert w1_r.shape[1] == 9 * cin
    hw, hw_s = H * W, Hs * Ws
    H2, W2 = Hs - 4, Ws - 4
    l1, l2 = (Hs - 2) * Ws, H2 * Ws

    x_flat = x.reshape(N, cin_x, hw).astype(compute_dtype)
    skip_flat = skip.reshape(N, cs, hw_s).astype(compute_dtype)

    kernel = functools.partial(_up_block_kernel, cs=cs, cu=cu, cin=cin, cmid=cmid,
                               ws=Ws, hw_s=hw_s, l1=l1, l2=l2)
    out_flat = pl.pallas_call(
        kernel,
        out_shape=jax.ShapeDtypeStruct((N, cout, l2), jnp.float32),
        grid=(N,),
        in_specs=[
            pl.BlockSpec((1, cin_x, hw), lambda n: (n, 0, 0)),
            pl.BlockSpec((1, cs, hw_s), lambda n: (n, 0, 0)),
            pl.BlockSpec((4 * cu, cin_x), lambda n: (0, 0)),
            pl.BlockSpec((4 * cu, 1), lambda n: (0, 0)),
            pl.BlockSpec((4, hw, hw_s), lambda n: (0, 0, 0)),
            pl.BlockSpec((cmid, 9 * cin), lambda n: (0, 0)),
            pl.BlockSpec((cout, 9 * cmid), lambda n: (0, 0)),
        ],
        out_specs=pl.BlockSpec((1, cout, l2), lambda n: (n, 0, 0)),
        scratch_shapes=[
            pltpu.VMEM((cin, hw_s + 2), compute_dtype),     # concat slab
            pltpu.VMEM((9 * cin, l1), compute_dtype),       # im2col for conv1
            pltpu.VMEM((cmid, l1 + 2), jnp.float32),        # h1 (f32 even on bf16 path)
            pltpu.VMEM((9 * cmid, l2), compute_dtype),      # im2col for conv2
        ],
        compiler_params=pltpu.CompilerParams(dimension_semantics=("parallel",)),
    )(x_flat, skip_flat, wup_r, bup_r, scat, w1_r, w2_r)

    # Flattened rows have width Ws; only the first W2 columns are valid.
    return out_flat.reshape(N, cout, H2, Ws)[..., :W2]


# -----------------------------------------------------------------------------
# Pure-JAX reference (lax convs) for the correctness check.
# -----------------------------------------------------------------------------
def up_forward_ref(x, skip, params):
    w_up, b_up, w1, w2 = params
    hi = jax.lax.Precision.HIGHEST
    rhs = jnp.flip(w_up, (2, 3)).transpose(1, 0, 2, 3)
    y = jax.lax.conv_general_dilated(
        x, rhs, window_strides=(1, 1), padding=((1, 1), (1, 1)),
        lhs_dilation=(2, 2), dimension_numbers=("NCHW", "OIHW", "NCHW"),
        precision=hi)
    y = y + b_up.reshape(1, -1, 1, 1)
    Hs, Ws = skip.shape[2], skip.shape[3]
    dY, dX = Hs - y.shape[2], Ws - y.shape[3]
    y = jnp.pad(y, ((0, 0), (0, 0), (dY // 2, dY - dY // 2), (dX // 2, dX - dX // 2)))
    cat = jnp.concatenate([skip, y], axis=1)
    h = jax.lax.conv_general_dilated(cat, w1, (1, 1), "VALID",
                                     dimension_numbers=("NCHW", "OIHW", "NCHW"),
                                     precision=hi)
    h = jnp.maximum(h, 0.0)
    h = jax.lax.conv_general_dilated(h, w2, (1, 1), "VALID",
                                     dimension_numbers=("NCHW", "OIHW", "NCHW"),
                                     precision=hi)
    return jnp.maximum(h, 0.0)


if __name__ == "__main__":
    key = jax.random.PRNGKey(0)
    k1, k2, k3, k4, k5, k6 = jax.random.split(key, 6)

    in_ch, out_ch = 8, 4
    # x has half the spatial size of skip (standard UNet); 7 -> 14 exercises padding.
    x = jax.random.normal(k1, (2, in_ch, 7, 7), jnp.float32)
    skip = jax.random.normal(k2, (2, in_ch // 2, 16, 16), jnp.float32)

    # Parameter shapes match the nn.Module __init__ (mid_channels == out_channels).
    w_up = jax.random.normal(k3, (in_ch, in_ch // 2, 2, 2), jnp.float32) * 0.2
    b_up = jax.random.normal(k4, (in_ch // 2,), jnp.float32) * 0.1
    w1 = jax.random.normal(k5, (out_ch, in_ch, 3, 3), jnp.float32) * 0.2
    w2 = jax.random.normal(k6, (out_ch, out_ch, 3, 3), jnp.float32) * 0.2
    params = (w_up, b_up, w1, w2)

    # One-time parameter/layout prep (hoisted out of the forward).
    prepped = prepare_up_params(params, x_spatial=(7, 7), skip_spatial=(16, 16))
    fwd = jax.jit(functools.partial(up_forward, prepped=prepped))

    out = jax.block_until_ready(fwd(x, skip))
    ref = up_forward_ref(x, skip, params)

    assert out.shape == (2, out_ch, 12, 12), out.shape
    err = float(jnp.max(jnp.abs(out - ref)))
    assert jnp.allclose(out, ref, atol=1e-2, rtol=1e-2), err

    print("KERNEL_OK")
</pallas_src>

<mosaic_0001>
module attributes {stable_mosaic.version = 11 : i64} {
  func.func @_up_block_kernel(%arg0: i32, %arg1: memref<1x8x49xf32, #tpu.memory_space<vmem>>, %arg2: memref<1x4x256xf32, #tpu.memory_space<vmem>>, %arg3: memref<16x8xf32, #tpu.memory_space<vmem>>, %arg4: memref<16x1xf32, #tpu.memory_space<vmem>>, %arg5: memref<4x49x256xf32, #tpu.memory_space<vmem>>, %arg6: memref<4x72xf32, #tpu.memory_space<vmem>>, %arg7: memref<4x36xf32, #tpu.memory_space<vmem>>, %arg8: memref<1x4x192xf32, #tpu.memory_space<vmem>>, %arg9: memref<8x258xf32, #tpu.memory_space<vmem>>, %arg10: memref<72x224xf32, #tpu.memory_space<vmem>>, %arg11: memref<4x226xf32, #tpu.memory_space<vmem>>, %arg12: memref<36x192xf32, #tpu.memory_space<vmem>>) attributes {dimension_semantics = [#tpu.dimension_semantics<parallel>], iteration_bounds = array<i64: 2>, scalar_prefetch = 0 : i64, scratch_operands = 4 : i64, tpu.core_type = #tpu.core_type<tc>, window_params = [{transform_indices = @transform_0, window_bounds = array<i64: 1, 8, 49>}, {transform_indices = @transform_1, window_bounds = array<i64: 1, 4, 256>}, {pipeline_mode = #tpu.pipeline_mode<synchronous>, transform_indices = @transform_2, window_bounds = array<i64: 16, 8>}, {pipeline_mode = #tpu.pipeline_mode<synchronous>, transform_indices = @transform_3, window_bounds = array<i64: 16, 1>}, {pipeline_mode = #tpu.pipeline_mode<synchronous>, transform_indices = @transform_4, window_bounds = array<i64: 4, 49, 256>}, {pipeline_mode = #tpu.pipeline_mode<synchronous>, transform_indices = @transform_5, window_bounds = array<i64: 4, 72>}, {pipeline_mode = #tpu.pipeline_mode<synchronous>, transform_indices = @transform_6, window_bounds = array<i64: 4, 36>}, {transform_indices = @transform_7, window_bounds = array<i64: 1, 4, 192>}]} {
    %c0 = arith.constant 0 : index
    %c0_0 = arith.constant 0 : index
    %0 = vector.load %arg3[%c0, %c0_0] : memref<16x8xf32, #tpu.memory_space<vmem>>, vector<16x8xf32>
    %c0_1 = arith.constant 0 : index
    %c0_2 = arith.constant 0 : index
    %c0_3 = arith.constant 0 : index
    %1 = vector.load %arg1[%c0_1, %c0_2, %c0_3] : memref<1x8x49xf32, #tpu.memory_space<vmem>>, vector<1x8x49xf32>
    %2 = vector.shape_cast %1 : vector<1x8x49xf32> to vector<8x49xf32>
    %cst = arith.constant dense<0.000000e+00> : vector<16x49xf32>
    %3 = tpu.matmul %0, %2, %cst {dimension_numbers = #tpu.dot_dimension_numbers<[1], [0], [0], [1], [0, 0, 1, 1], [], []>} : vector<16x8xf32>, vector<8x49xf32>, vector<16x49xf32> -> vector<16x49xf32>
    %c0_4 = arith.constant 0 : index
    %c0_5 = arith.constant 0 : index
    %4 = vector.load %arg4[%c0_4, %c0_5] : memref<16x1xf32, #tpu.memory_space<vmem>>, vector<16x1xf32>
    %5 = vector.broadcast %4 : vector<16x1xf32> to vector<16x49xf32>
    %6 = arith.addf %3, %5 : vector<16x49xf32>
    %7 = vector.extract_strided_slice %6 {offsets = [0, 0], sizes = [4, 49], strides = [1, 1]} : vector<16x49xf32> to vector<4x49xf32>
    %c0_6 = arith.constant 0 : index
    %c0_7 = arith.constant 0 : index
    %c0_8 = arith.constant 0 : index
    %8 = vector.load %arg5[%c0_6, %c0_7, %c0_8] : memref<4x49x256xf32, #tpu.memory_space<vmem>>, vector<1x49x256xf32>
    %9 = vector.shape_cast %8 : vector<1x49x256xf32> to vector<49x256xf32>
    %cst_9 = arith.constant dense<0.000000e+00> : vector<4x256xf32>
    %10 = tpu.matmul %7, %9, %cst_9 {dimension_numbers = #tpu.dot_dimension_numbers<[1], [0], [0], [1], [0, 0, 1, 1], [], []>} : vector<4x49xf32>, vector<49x256xf32>, vector<4x256xf32> -> vector<4x256xf32>
    %11 = vector.extract_strided_slice %6 {offsets = [4, 0], sizes = [4, 49], strides = [1, 1]} : vector<16x49xf32> to vector<4x49xf32>
    %c1 = arith.constant 1 : index
    %c0_10 = arith.constant 0 : index
    %c0_11 = arith.constant 0 : index
    %12 = vector.load %arg5[%c1, %c0_10, %c0_11] : memref<4x49x256xf32, #tpu.memory_space<vmem>>, vector<1x49x256xf32>
    %13 = vector.shape_cast %12 : vector<1x49x256xf32> to vector<49x256xf32>
    %cst_12 = arith.constant dense<0.000000e+00> : vector<4x256xf32>
    %14 = tpu.matmul %11, %13, %cst_12 {dimension_numbers = #tpu.dot_dimension_numbers<[1], [0], [0], [1], [0, 0, 1, 1], [], []>} : vector<4x49xf32>, vector<49x256xf32>, vector<4x256xf32> -> vector<4x256xf32>
    %15 = arith.addf %10, %14 : vector<4x256xf32>
    %16 = vector.extract_strided_slice %6 {offsets = [8, 0], sizes = [4, 49], strides = [1, 1]} : vector<16x49xf32> to vector<4x49xf32>
    %c2 = arith.constant 2 : index
    %c0_13 = arith.constant 0 : index
    %c0_14 = arith.constant 0 : index
    %17 = vector.load %arg5[%c2, %c0_13, %c0_14] : memref<4x49x256xf32, #tpu.memory_space<vmem>>, vector<1x49x256xf32>
    %18 = vector.shape_cast %17 : vector<1x49x256xf32> to vector<49x256xf32>
    %cst_15 = arith.constant dense<0.000000e+00> : vector<4x256xf32>
    %19 = tpu.matmul %16, %18, %cst_15 {dimension_numbers = #tpu.dot_dimension_numbers<[1], [0], [0], [1], [0, 0, 1, 1], [], []>} : vector<4x49xf32>, vector<49x256xf32>, vector<4x256xf32> -> vector<4x256xf32>
    %20 = arith.addf %15, %19 : vector<4x256xf32>
    %21 = vector.extract_strided_slice %6 {offsets = [12, 0], sizes = [4, 49], strides = [1, 1]} : vector<16x49xf32> to vector<4x49xf32>
    %c3 = arith.constant 3 : index
    %c0_16 = arith.constant 0 : index
    %c0_17 = arith.constant 0 : index
    %22 = vector.load %arg5[%c3, %c0_16, %c0_17] : memref<4x49x256xf32, #tpu.memory_space<vmem>>, vector<1x49x256xf32>
    %23 = vector.shape_cast %22 : vector<1x49x256xf32> to vector<49x256xf32>
    %cst_18 = arith.constant dense<0.000000e+00> : vector<4x256xf32>
    %24 = tpu.matmul %21, %23, %cst_18 {dimension_numbers = #tpu.dot_dimension_numbers<[1], [0], [0], [1], [0, 0, 1, 1], [], []>} : vector<4x49xf32>, vector<49x256xf32>, vector<4x256xf32> -> vector<4x256xf32>
    %25 = arith.addf %20, %24 : vector<4x256xf32>
    %c0_19 = arith.constant 0 : index
    %c0_20 = arith.constant 0 : index
    %c0_21 = arith.constant 0 : index
    %26 = vector.load %arg2[%c0_19, %c0_20, %c0_21] : memref<1x4x256xf32, #tpu.memory_space<vmem>>, vector<1x4x256xf32>
    %27 = vector.shape_cast %26 : vector<1x4x256xf32> to vector<4x256xf32>
    %c0_22 = arith.constant 0 : index
    %c0_23 = arith.constant 0 : index
    %28 = vector.load %arg9[%c0_22, %c0_23] : memref<8x258xf32, #tpu.memory_space<vmem>>, vector<4x256xf32>
    tpu.vector_store %arg9[%c0_22, %c0_23], %27 {strides = array<i32>} : memref<8x258xf32, #tpu.memory_space<vmem>>, vector<4x256xf32>,
    %c4 = arith.constant 4 : index
    %c0_24 = arith.constant 0 : index
    %29 = vector.load %arg9[%c4, %c0_24] : memref<8x258xf32, #tpu.memory_space<vmem>>, vector<4x256xf32>
    tpu.vector_store %arg9[%c4, %c0_24], %25 {strides = array<i32>} : memref<8x258xf32, #tpu.memory_space<vmem>>, vector<4x256xf32>,
    %cst_25 = arith.constant 0.000000e+00 : f32
    %30 = vector.broadcast %cst_25 : f32 to vector<8x2xf32>
    %c0_26 = arith.constant 0 : index
    %c256 = arith.constant 256 : index
    %31 = vector.load %arg9[%c0_26, %c256] : memref<8x258xf32, #tpu.memory_space<vmem>>, vector<8x2xf32>
    tpu.vector_store %arg9[%c0_26, %c256], %30 {strides = array<i32>} : memref<8x258xf32, #tpu.memory_space<vmem>>, vector<8x2xf32>,
    %c0_27 = arith.constant 0 : index
    %c0_28 = arith.constant 0 : index
    %32 = vector.load %arg9[%c0_27, %c0_28] : memref<8x258xf32, #tpu.memory_space<vmem>>, vector<8x224xf32>
    %c0_29 = arith.constant 0 : index
    %c0_30 = arith.constant 0 : index
    %33 = vector.load %arg10[%c0_29, %c0_30] : memref<72x224xf32, #tpu.memory_space<vmem>>, vector<8x224xf32>
    tpu.vector_store %arg10[%c0_29, %c0_30], %32 {strides = array<i32>} : memref<72x224xf32, #tpu.memory_space<vmem>>, vector<8x224xf32>,
    %c0_31 = arith.constant 0 : index
    %c1_32 = arith.constant 1 : index
    %34 = vector.load %arg9[%c0_31, %c1_32] : memref<8x258xf32, #tpu.memory_space<vmem>>, vector<8x224xf32>
    %c8 = arith.constant 8 : index
    %c0_33 = arith.constant 0 : index
    %35 = vector.load %arg10[%c8, %c0_33] : memref<72x224xf32, #tpu.memory_space<vmem>>, vector<8x224xf32>
    tpu.vector_store %arg10[%c8, %c0_33], %34 {strides = array<i32>} : memref<72x224xf32, #tpu.memory_space<vmem>>, vector<8x224xf32>,
    %c0_34 = arith.constant 0 : index
    %c2_35 = arith.constant 2 : index
    %36 = vector.load %arg9[%c0_34, %c2_35] : memref<8x258xf32, #tpu.memory_space<vmem>>, vector<8x224xf32>
    %c16 = arith.constant 16 : index
    %c0_36 = arith.constant 0 : index
    %37 = vector.load %arg10[%c16, %c0_36] : memref<72x224xf32, #tpu.memory_space<vmem>>, vector<8x224xf32>
    tpu.vector_store %arg10[%c16, %c0_36], %36 {strides = array<i32>} : memref<72x224xf32, #tpu.memory_space<vmem>>, vector<8x224xf32>,
    %c0_37 = arith.constant 0 : index
    %c16_38 = arith.constant 16 : index
    %38 = vector.load %arg9[%c0_37, %c16_38] : memref<8x258xf32, #tpu.memory_space<vmem>>, vector<8x224xf32>
    %c24 = arith.constant 24 : index
    %c0_39 = arith.constant 0 : index
    %39 = vector.load %arg10[%c24, %c0_39] : memref<72x224xf32, #tpu.memory_space<vmem>>, vector<8x224xf32>
    tpu.vector_store %arg10[%c24, %c0_39], %38 {strides = array<i32>} : memref<72x224xf32, #tpu.memory_space<vmem>>, vector<8x224xf32>,
    %c0_40 = arith.constant 0 : index
    %c17 = arith.constant 17 : index
    %40 = vector.load %arg9[%c0_40, %c17] : memref<8x258xf32, #tpu.memory_space<vmem>>, vector<8x224xf32>
    %c32 = arith.constant 32 : index
    %c0_41 = arith.constant 0 : index
    %41 = vector.load %arg10[%c32, %c0_41] : memref<72x224xf32, #tpu.memory_space<vmem>>, vector<8x224xf32>
    tpu.vector_store %arg10[%c32, %c0_41], %40 {strides = array<i32>} : memref<72x224xf32, #tpu.memory_space<vmem>>, vector<8x224xf32>,
    %c0_42 = arith.constant 0 : index
    %c18 = arith.constant 18 : index
    %42 = vector.load %arg9[%c0_42, %c18] : memref<8x258xf32, #tpu.memory_space<vmem>>, vector<8x224xf32>
    %c40 = arith.constant 40 : index
    %c0_43 = arith.constant 0 : index
    %43 = vector.load %arg10[%c40, %c0_43] : memref<72x224xf32, #tpu.memory_space<vmem>>, vector<8x224xf32>
    tpu.vector_store %arg10[%c40, %c0_43], %42 {strides = array<i32>} : memref<72x224xf32, #tpu.memory_space<vmem>>, vector<8x224xf32>,
    %c0_44 = arith.constant 0 : index
    %c32_45 = arith.constant 32 : index
    %44 = vector.load %arg9[%c0_44, %c32_45] : memref<8x258xf32, #tpu.memory_space<vmem>>, vector<8x224xf32>
    %c48 = arith.constant 48 : index
    %c0_46 = arith.constant 0 : index
    %45 = vector.load %arg10[%c48, %c0_46] : memref<72x224xf32, #tpu.memory_space<vmem>>, vector<8x224xf32>
    tpu.vector_store %arg10[%c48, %c0_46], %44 {strides = array<i32>} : memref<72x224xf32, #tpu.memory_space<vmem>>, vector<8x224xf32>,
    %c0_47 = arith.constant 0 : index
    %c33 = arith.constant 33 : index
    %46 = vector.load %arg9[%c0_47, %c33] : memref<8x258xf32, #tpu.memory_space<vmem>>, vector<8x224xf32>
    %c56 = arith.constant 56 : index
    %c0_48 = arith.constant 0 : index
    %47 = vector.load %arg10[%c56, %c0_48] : memref<72x224xf32, #tpu.memory_space<vmem>>, vector<8x224xf32>
    tpu.vector_store %arg10[%c56, %c0_48], %46 {strides = array<i32>} : memref<72x224xf32, #tpu.memory_space<vmem>>, vector<8x224xf32>,
    %c0_49 = arith.constant 0 : index
    %c34 = arith.constant 34 : index
    %48 = vector.load %arg9[%c0_49, %c34] : memref<8x258xf32, #tpu.memory_space<vmem>>, vector<8x224xf32>
    %c64 = arith.constant 64 : index
    %c0_50 = arith.constant 0 : index
    %49 = vector.load %arg10[%c64, %c0_50] : memref<72x224xf32, #tpu.memory_space<vmem>>, vector<8x224xf32>
    tpu.vector_store %arg10[%c64, %c0_50], %48 {strides = array<i32>} : memref<72x224xf32, #tpu.memory_space<vmem>>, vector<8x224xf32>,
    %c0_51 = arith.constant 0 : index
    %c0_52 = arith.constant 0 : index
    %50 = vector.load %arg6[%c0_51, %c0_52] : memref<4x72xf32, #tpu.memory_space<vmem>>, vector<4x72xf32>
    %c0_53 = arith.constant 0 : index
    %c0_54 = arith.constant 0 : index
    %51 = vector.load %arg10[%c0_53, %c0_54] : memref<72x224xf32, #tpu.memory_space<vmem>>, vector<72x224xf32>
    %cst_55 = arith.constant dense<0.000000e+00> : vector<4x224xf32>
    %52 = tpu.matmul %50, %51, %cst_55 {dimension_numbers = #tpu.dot_dimension_numbers<[1], [0], [0], [1], [0, 0, 1, 1], [], []>} : vector<4x72xf32>, vector<72x224xf32>, vector<4x224xf32> -> vector<4x224xf32>
    %cst_56 = arith.constant 0.000000e+00 : f32
    %53 = vector.broadcast %cst_56 : f32 to vector<4x224xf32>
    %54 = arith.maximumf %52, %53 : vector<4x224xf32>
    %c0_57 = arith.constant 0 : index
    %c0_58 = arith.constant 0 : index
    %55 = vector.load %arg11[%c0_57, %c0_58] : memref<4x226xf32, #tpu.memory_space<vmem>>, vector<4x224xf32>
    tpu.vector_store %arg11[%c0_57, %c0_58], %54 {strides = array<i32>} : memref<4x226xf32, #tpu.memory_space<vmem>>, vector<4x224xf32>,
    %cst_59 = arith.constant 0.000000e+00 : f32
    %56 = vector.broadcast %cst_59 : f32 to vector<4x2xf32>
    %c0_60 = arith.constant 0 : index
    %c224 = arith.constant 224 : index
    %57 = vector.load %arg11[%c0_60, %c224] : memref<4x226xf32, #tpu.memory_space<vmem>>, vector<4x2xf32>
    tpu.vector_store %arg11[%c0_60, %c224], %56 {strides = array<i32>} : memref<4x226xf32, #tpu.memory_space<vmem>>, vector<4x2xf32>,
    %c0_61 = arith.constant 0 : index
    %c0_62 = arith.constant 0 : index
    %58 = vector.load %arg11[%c0_61, %c0_62] : memref<4x226xf32, #tpu.memory_space<vmem>>, vector<4x192xf32>
    %c0_63 = arith.constant 0 : index
    %c0_64 = arith.constant 0 : index
    %59 = vector.load %arg12[%c0_63, %c0_64] : memref<36x192xf32, #tpu.memory_space<vmem>>, vector<4x192xf32>
    tpu.vector_store %arg12[%c0_63, %c0_64], %58 {strides = array<i32>} : memref<36x192xf32, #tpu.memory_space<vmem>>, vector<4x192xf32>,
    %c0_65 = arith.constant 0 : index
    %c1_66 = arith.constant 1 : index
    %60 = vector.load %arg11[%c0_65, %c1_66] : memref<4x226xf32, #tpu.memory_space<vmem>>, vector<4x192xf32>
    %c4_67 = arith.constant 4 : index
    %c0_68 = arith.constant 0 : index
    %61 = vector.load %arg12[%c4_67, %c0_68] : memref<36x192xf32, #tpu.memory_space<vmem>>, vector<4x192xf32>
    tpu.vector_store %arg12[%c4_67, %c0_68], %60 {strides = array<i32>} : memref<36x192xf32, #tpu.memory_space<vmem>>, vector<4x192xf32>,
    %c0_69 = arith.constant 0 : index
    %c2_70 = arith.constant 2 : index
    %62 = vector.load %arg11[%c0_69, %c2_70] : memref<4x226xf32, #tpu.memory_space<vmem>>, vector<4x192xf32>
    %c8_71 = arith.constant 8 : index
    %c0_72 = arith.constant 0 : index
    %63 = vector.load %arg12[%c8_71, %c0_72] : memref<36x192xf32, #tpu.memory_space<vmem>>, vector<4x192xf32>
    tpu.vector_store %arg12[%c8_71, %c0_72], %62 {strides = array<i32>} : memref<36x192xf32, #tpu.memory_space<vmem>>, vector<4x192xf32>,
    %c0_73 = arith.constant 0 : index
    %c16_74 = arith.constant 16 : index
    %64 = vector.load %arg11[%c0_73, %c16_74] : memref<4x226xf32, #tpu.memory_space<vmem>>, vector<4x192xf32>
    %c12 = arith.constant 12 : index
    %c0_75 = arith.constant 0 : index
    %65 = vector.load %arg12[%c12, %c0_75] : memref<36x192xf32, #tpu.memory_space<vmem>>, vector<4x192xf32>
    tpu.vector_store %arg12[%c12, %c0_75], %64 {strides = array<i32>} : memref<36x192xf32, #tpu.memory_space<vmem>>, vector<4x192xf32>,
    %c0_76 = arith.constant 0 : index
    %c17_77 = arith.constant 17 : index
    %66 = vector.load %arg11[%c0_76, %c17_77] : memref<4x226xf32, #tpu.memory_space<vmem>>, vector<4x192xf32>
    %c16_78 = arith.constant 16 : index
    %c0_79 = arith.constant 0 : index
    %67 = vector.load %arg12[%c16_78, %c0_79] : memref<36x192xf32, #tpu.memory_space<vmem>>, vector<4x192xf32>
    tpu.vector_store %arg12[%c16_78, %c0_79], %66 {strides = array<i32>} : memref<36x192xf32, #tpu.memory_space<vmem>>, vector<4x192xf32>,
    %c0_80 = arith.constant 0 : index
    %c18_81 = arith.constant 18 : index
    %68 = vector.load %arg11[%c0_80, %c18_81] : memref<4x226xf32, #tpu.memory_space<vmem>>, vector<4x192xf32>
    %c20 = arith.constant 20 : index
    %c0_82 = arith.constant 0 : index
    %69 = vector.load %arg12[%c20, %c0_82] : memref<36x192xf32, #tpu.memory_space<vmem>>, vector<4x192xf32>
    tpu.vector_store %arg12[%c20, %c0_82], %68 {strides = array<i32>} : memref<36x192xf32, #tpu.memory_space<vmem>>, vector<4x192xf32>,
    %c0_83 = arith.constant 0 : index
    %c32_84 = arith.constant 32 : index
    %70 = vector.load %arg11[%c0_83, %c32_84] : memref<4x226xf32, #tpu.memory_space<vmem>>, vector<4x192xf32>
    %c24_85 = arith.constant 24 : index
    %c0_86 = arith.constant 0 : index
    %71 = vector.load %arg12[%c24_85, %c0_86] : memref<36x192xf32, #tpu.memory_space<vmem>>, vector<4x192xf32>
    tpu.vector_store %arg12[%c24_85, %c0_86], %70 {strides = array<i32>} : memref<36x192xf32, #tpu.memory_space<vmem>>, vector<4x192xf32>,
    %c0_87 = arith.constant 0 : index
    %c33_88 = arith.constant 33 : index
    %72 = vector.load %arg11[%c0_87, %c33_88] : memref<4x226xf32, #tpu.memory_space<vmem>>, vector<4x192xf32>
    %c28 = arith.constant 28 : index
    %c0_89 = arith.constant 0 : index
    %73 = vector.load %arg12[%c28, %c0_89] : memref<36x192xf32, #tpu.memory_space<vmem>>, vector<4x192xf32>
    tpu.vector_store %arg12[%c28, %c0_89], %72 {strides = array<i32>} : memref<36x192xf32, #tpu.memory_space<vmem>>, vector<4x192xf32>,
    %c0_90 = arith.constant 0 : index
    %c34_91 = arith.constant 34 : index
    %74 = vector.load %arg11[%c0_90, %c34_91] : memref<4x226xf32, #tpu.memory_space<vmem>>, vector<4x192xf32>
    %c32_92 = arith.constant 32 : index
    %c0_93 = arith.constant 0 : index
    %75 = vector.load %arg12[%c32_92, %c0_93] : memref<36x192xf32, #tpu.memory_space<vmem>>, vector<4x192xf32>
    tpu.vector_store %arg12[%c32_92, %c0_93], %74 {strides = array<i32>} : memref<36x192xf32, #tpu.memory_space<vmem>>, vector<4x192xf32>,
    %c0_94 = arith.constant 0 : index
    %c0_95 = arith.constant 0 : index
    %76 = vector.load %arg7[%c0_94, %c0_95] : memref<4x36xf32, #tpu.memory_space<vmem>>, vector<4x36xf32>
    %c0_96 = arith.constant 0 : index
    %c0_97 = arith.constant 0 : index
    %77 = vector.load %arg12[%c0_96, %c0_97] : memref<36x192xf32, #tpu.memory_space<vmem>>, vector<36x192xf32>
    %cst_98 = arith.constant dense<0.000000e+00> : vector<4x192xf32>
    %78 = tpu.matmul %76, %77, %cst_98 {dimension_numbers = #tpu.dot_dimension_numbers<[1], [0], [0], [1], [0, 0, 1, 1], [], []>} : vector<4x36xf32>, vector<36x192xf32>, vector<4x192xf32> -> vector<4x192xf32>
    %cst_99 = arith.constant 0.000000e+00 : f32
    %79 = vector.broadcast %cst_99 : f32 to vector<4x192xf32>
    %80 = arith.maximumf %78, %79 : vector<4x192xf32>
    %c0_100 = arith.constant 0 : index
    %c0_101 = arith.constant 0 : index
    %c0_102 = arith.constant 0 : index
    %81 = vector.load %arg8[%c0_100, %c0_101, %c0_102] : memref<1x4x192xf32, #tpu.memory_space<vmem>>, vector<1x4x192xf32>
    %82 = vector.shape_cast %81 : vector<1x4x192xf32> to vector<4x192xf32>
    %83 = vector.shape_cast %80 : vector<4x192xf32> to vector<1x4x192xf32>
    tpu.vector_store %arg8[%c0_100, %c0_101, %c0_102], %83 {strides = array<i32>} : memref<1x4x192xf32, #tpu.memory_space<vmem>>, vector<1x4x192xf32>,
    return
  }
  func.func @transform_0(%arg0: i32) -> (i32, i32, i32) {
    %c0_i32 = arith.constant 0 : i32
    %c0_i32_0 = arith.constant 0 : i32
    %c0_i32_1 = arith.constant 0 : i32
    return %arg0, %c0_i32, %c0_i32_0 : i32, i32, i32
  }
  func.func @transform_1(%arg0: i32) -> (i32, i32, i32) {
    %c0_i32 = arith.constant 0 : i32
    %c0_i32_0 = arith.constant 0 : i32
    %c0_i32_1 = arith.constant 0 : i32
    return %arg0, %c0_i32, %c0_i32_0 : i32, i32, i32
  }
  func.func @transform_2(%arg0: i32) -> (i32, i32) {
    %c0_i32 = arith.constant 0 : i32
    %c0_i32_0 = arith.constant 0 : i32
    %c0_i32_1 = arith.constant 0 : i32
    return %c0_i32, %c0_i32_0 : i32, i32
  }
  func.func @transform_3(%arg0: i32) -> (i32, i32) {
    %c0_i32 = arith.constant 0 : i32
    %c0_i32_0 = arith.constant 0 : i32
    %c0_i32_1 = arith.constant 0 : i32
    return %c0_i32, %c0_i32_0 : i32, i32
  }
  func.func @transform_4(%arg0: i32) -> (i32, i32, i32) {
    %c0_i32 = arith.constant 0 : i32
    %c0_i32_0 = arith.constant 0 : i32
    %c0_i32_1 = arith.constant 0 : i32
    %c0_i32_2 = arith.constant 0 : i32
    return %c0_i32, %c0_i32_0, %c0_i32_1 : i32, i32, i32
  }
  func.func @transform_5(%arg0: i32) -> (i32, i32) {
    %c0_i32 = arith.constant 0 : i32
    %c0_i32_0 = arith.constant 0 : i32
    %c0_i32_1 = arith.constant 0 : i32
    return %c0_i32, %c0_i32_0 : i32, i32
  }
  func.func @transform_6(%arg0: i32) -> (i32, i32) {
    %c0_i32 = arith.constant 0 : i32
    %c0_i32_0 = arith.constant 0 : i32
    %c0_i32_1 = arith.constant 0 : i32
    return %c0_i32, %c0_i32_0 : i32, i32
  }
  func.func @transform_7(%arg0: i32) -> (i32, i32, i32) {
    %c0_i32 = arith.constant 0 : i32
    %c0_i32_0 = arith.constant 0 : i32
    %c0_i32_1 = arith.constant 0 : i32
    return %arg0, %c0_i32, %c0_i32_0 : i32, i32, i32
  }
}

</mosaic_0001>

<bundles_post_ra>
// kernel: up_forward.1
= control target key start
LH: loop header
LB: loop body
LE: loop exit
PB: predicated region body
PF: predicated region fallthrough
CT: control target
= control target key end

     0   :  { %12 = vsyncpa [#allocation7], 0  ;;  %s1283_s24 = smov 0   ;;  %s1429_s0 = inlined_call_operand.vmem [shape: f32[2,8,49], index: 0, kind: input, shape index: {}]   ;;  %s1430_s1 = inlined_call_operand.vmem [shape: f32[2,4,256], index: 1, kind: input, shape index: {}]   ;;  %s1431_s2 = inlined_call_operand.vmem [shape: f32[16,8], index: 2, kind: input, shape index: {}]   ;;  %s1432_s3 = inlined_call_operand.vmem [shape: f32[16,1], index: 3, kind: input, shape index: {}]   ;;  %s1433_s4 = inlined_call_operand.hbm [shape: f32[4,49,256], index: 4, kind: input, shape index: {}]   ;;  %s1434_s5 = inlined_call_operand.vmem [shape: f32[4,72], index: 5, kind: input, shape index: {}]   ;;  %s1435_s6 = inlined_call_operand.vmem [shape: f32[4,36], index: 6, kind: input, shape index: {}]   ;;  %s1436_s7 = inlined_call_operand.vmem [shape: f32[2,4,192], index: 7, kind: output, shape index: {}]  }
   0x1 LB: > { %s223_s27 = sshll.u32 %s1433_s4, 4  ;;  %s1116_s28 = sadd.s32 4294967295, %s1228_s24   ;;  %s1228_s24 = sphi %s1283_s24, %s18_s24   ;;  %s224_s27 = int_to_ptr.hbm [resolvable:$true] %s223_s27 }
   0x2   : > { %p1118_p0 = scmp.ge.s32.totalorder %s1228_s24, 1  ;;  %p206_p1 = scmp.lt.s32.totalorder %s1228_s24, 3 }
   0x3   : > { %p1164_p2 = scmp.eq.s32.totalorder %s1116_s28, 0  ;;  %s1230_s29 = smov [#allocation6]  }
   0x4   : > { %p207_p3 = pnand %p1118_p0, %p206_p1  ;;  %s225_s30 = sshll.u32 %s1230_s29, 4  ;;  %s226_s30 = int_to_ptr.vmem [resolvable:$true] %s225_s30 }
   0x5   : > { %s1231_s8 = smov 256   ;;  %s1232_s9 = smov 16  }
   0x6   : > { %p1160_p4 = pneg %p207_p3  ;;  %262 = sbr.rel (%p207_p3) target bundleno = 943 (0x3af), region = 48 }
   0x8   : > { %p1161_p5 = pnand %p1164_p2, %p1160_p4 }
   0xa   : > { %1163 = dma.hbm_to_vmem [thread:$0]  (!%p1161_p5), %s224_s27, 7168, %s226_s30, [#allocation7], %s1231_s8, %s1231_s8, %s1232_s9  }
   0xb   : > { %1223 = dma.done.wait (%p1164_p2), [#allocation7], 7168  }
   0xc   : > { %1225 = vsyncadd (%p1164_p2), [#allocation7], 4294960128  ;;  %p299_p6 = scmp.lt.s32.totalorder %s1116_s28, 1  ;;  %v1233_v0 = vmov 0   ;;  %vm328_vm0 = vcmask 64512   ;;  %v313_v3 = vld [vmem:[%s1431_s2] sm:$0xff] }
   0xd   : > { %1187 = vset.pattern.permute.xlu0 %v1233_v0  ;;  %vm392_vm1 = vcmask 1040384   ;;  %v316_v4 = vld [vmem:[%s1432_s3] sm:$0xff]  ;;  %v385_v5 = vld [vmem:[#allocation6 + $0xd0] sm:$0x1]  ;;  %v370_v7 = vld [vmem:[#allocation6 + $0x60] sm:$0x1] }
   0xe   : > { %s1438_s28 = smov (!%p299_p6, %s1116_s28), 1  ;;  %320 = vperm.xlu0 %1187, %v316_v4   ;;  %v386_v6 = vld [vmem:[#allocation6 + $0xd8] sm:$0x1]  ;;  %1130 = vmatpush.msk.msra.mxu1 %vm392_vm1, %v385_v5  ;;  %v371_v8 = vld [vmem:[#allocation6 + $0x68] sm:$0x1]  ;;  %v383_v9 = vld [vmem:[#allocation6 + $0xc0] sm:$0xff] }
   0xf   : > { %s1294_s10 = sshll.u32 %s1438_s28, 3  ;;  %1132 = vmatpush.msk.msra.mxu2 %vm392_vm1, %v386_v6  ;;  %v384_v10 = vld [vmem:[#allocation6 + $0xc8] sm:$0xff]  ;;  %1134 = vmatpush.msk.msra.mxu3 %vm392_vm1, %v370_v7  ;;  %v368_v11 = vld [vmem:[#allocation6 + $0x50] sm:$0xff]  ;;  %v369_v12 = vld [vmem:[#allocation6 + $0x58] sm:$0xff]  ;;  %vm389_vm2 = vcmask 400384   ;;  %vm636_vm3 = vcmask 15360  }
  0x10   : > { %s302_s13 = scalar_lea.vmem %s1429_s0, %s1294_s10  ;;  %s307_s16 = scalar_lea.vmem %s1430_s1, %s1294_s10  ;;  %v381_v13 = vld [vmem:[#allocation6 + $0xb0] sm:$0xff]  ;;  %409 = vmatpush.msra.mxu1 %v383_v9  ;;  %v382_v14 = vld [vmem:[#allocation6 + $0xb8] sm:$0xff]  ;;  %v366_v15 = vld [vmem:[#allocation6 + $0x40] sm:$0xff]  ;;  %v1234_v9 = vmov 0.0   ;;  %vm641_vm4 = vcmask 785408   ;;  %vm738_vm5 = vcmask 777216  }
  0x11   : > { %v315_v1 = vld [vmem:[%s302_s13] sm:$0xff]  ;;  %429 = vmatpush.msra.mxu2 %v384_v10  ;;  %v367_v16 = vld [vmem:[#allocation6 + $0x48] sm:$0xff]  ;;  %457 = vmatpush.msra.mxu3 %v368_v11  ;;  %v314_v17 = vld [vmem:[%s1431_s2 + $0x8] sm:$0xff]  ;;  %637 = vst.msk [vmem:[#allocation2 + $0x10] sm:$0xff] %vm636_vm3, %v1234_v9  ;;  %s1235_s26 = smov 94   ;;  %s1236_s27 = smov 95  }
  0x12   : > { %v619_v2 = vld [vmem:[%s307_s16] sm:$0xff]  ;;  %350 = vmatpush.msra.mxu0 %v315_v1  ;;  %v317_v18 = vld [vmem:[%s1432_s3 + $0x8] sm:$0xff]  ;;  %410 = vmatpush.msra.mxu1 %v381_v13  ;;  %v380_v22 = vld [vmem:[#allocation6 + $0xa8] sm:$0xff]  ;;  %s1237_s28 = smov 96   ;;  %s1238_s29 = smov 110   ;;  %vm757_vm6 = vcmask 769024  }
  0x13   : > { %621 = vst [vmem:[#allocation1] ss:$2 sm:$0xff] %v619_v2  ;;  %1128 = vmatmul.msk.f32.vlgmr.msra.gmra.mxu0 %vm328_vm0, %v313_v3  ;;  %430 = vmatpush.msra.mxu2 %v382_v14  ;;  %v379_v21 = vld [vmem:[#allocation6 + $0xa0] sm:$0xff]  ;;  %v364_v23 = vld [vmem:[#allocation6 + $0x30] sm:$0xff]  ;;  %v365_v24 = vld [vmem:[#allocation6 + $0x38] sm:$0xff]  ;;  %s1239_s30 = smov 111   ;;  %s312_s18 = scalar_lea.vmem %s1436_s7, %s1294_s10 }
  0x14   : > { %1136 = vmatpush.msk.msrb.mxu0 %vm392_vm1, %v371_v8  ;;  %458 = vmatpush.msra.mxu3 %v366_v15  ;;  %v377_v25 = vld [vmem:[#allocation6 + $0x90] sm:$0xff]  ;;  %v378_v26 = vld [vmem:[#allocation6 + $0x98] sm:$0xff]  ;;  %v362_v27 = vld [vmem:[#allocation6 + $0x20] sm:$0xff]  ;;  %s1240_s8 = smov 126   ;;  %s1241_s9 = smov 112   ;;  %vm679_vm7 = vcmask 916480  }
  0x15   : > { %411 = vmatpush.msra.mxu1 %v379_v21  ;;  %431 = vmatpush.msra.mxu2 %v380_v22  ;;  %v363_v28 = vld [vmem:[#allocation6 + $0x28] sm:$0xff]  ;;  %v375_v29 = vld [vmem:[#allocation6 + $0x80] sm:$0xff]  ;;  %v360_v31 = vld [vmem:[#allocation6 + $0x10] sm:$0xff]  ;;  %s1242_s11 = smov 127   ;;  %vm707_vm8 = vcmask 900096   ;;  %vm693_vm9 = vcmask 908288  }
  0x16   : > { %477 = vmatpush.msrb.mxu0 %v369_v12  ;;  %325 = vperm.xlu0 %1187, %v317_v18   ;;  %v376_v30 = vld [vmem:[#allocation6 + $0x88] sm:$0xff]  ;;  %v361_v32 = vld [vmem:[#allocation6 + $0x18] sm:$0xff]  ;;  %v373_v33 = vld [vmem:[#allocation6 + $0x70] sm:$0xff]  ;;  %vm665_vm10 = vcmask 1031168   ;;  %vm783_vm11 = vcmask 588800   ;;  %vm651_vm12 = vcmask 1039360  }
  0x17   : > { %459 = vmatpush.msra.mxu3 %v364_v23  ;;  %412 = vmatpush.msra.mxu1 %v377_v25  ;;  %v374_v34 = vld [vmem:[#allocation6 + $0x78] sm:$0xff]  ;;  %v358_v35 = vld [vmem:[#allocation6] sm:$0xff]  ;;  %v359_v36 = vld [vmem:[#allocation6 + $0x8] sm:$0xff]  ;;  %vm832_vm13 = vcmask 1043456   ;;  %vm835_vm14 = vcmask 785412   ;;  %vm978_vm3 = vcmask 293888  }
  0x18   : > { %478 = vmatpush.msrb.mxu0 %v367_v16  ;;  %432 = vmatpush.msra.mxu2 %v378_v26  ;;  %v500_v37 = vld [vmem:[#allocation6 + $0x140] sm:$0x1]  ;;  %v501_v38 = vld [vmem:[#allocation6 + $0x148] sm:$0x1]  ;;  %v566_v39 = vld [vmem:[#allocation6 + $0x1b0] sm:$0x1] }
  0x19   : > { %460 = vmatpush.msra.mxu3 %v362_v27  ;;  %413 = vmatpush.msra.mxu1 %v375_v29  ;;  %v567_v40 = vld [vmem:[#allocation6 + $0x1b8] sm:$0x1]  ;;  %v498_v41 = vld [vmem:[#allocation6 + $0x130] sm:$0xff]  ;;  %v564_v43 = vld [vmem:[#allocation6 + $0x1a0] sm:$0xff] }
  0x1a   : > { %v622_v19 = vld.sshfl [vmem:[#allocation1] sm:$0xff pattern:$0x75316420]  ;;  %v623_v20 = vld.sshfl [vmem:[#allocation1 + $0x8] sm:$0xff pattern:$0x75316420]  ;;  %479 = vmatpush.msrb.mxu0 %v365_v24  ;;  %433 = vmatpush.msra.mxu2 %v376_v30  ;;  %vm836_vm15 = vmor %vm835_vm14, %vm832_vm13 }
  0x1b   : > { %626 = vst [vmem:[#allocation2] sm:$0xf] %v622_v19  ;;  %1129 = vmatmul.msk.f32.gmra.mxu0 %vm328_vm0, %v314_v17  ;;  %461 = vmatpush.msra.mxu3 %v360_v31  ;;  %v499_v42 = vld [vmem:[#allocation6 + $0x138] sm:$0xff]  ;;  %v565_v44 = vld [vmem:[#allocation6 + $0x1a8] sm:$0xff]  ;;  %v496_v45 = vld [vmem:[#allocation6 + $0x120] sm:$0xff]  ;;  %vm838_vm0 = vcmask 798464  }
  0x1c   : > { %627 = vst [vmem:[#allocation2 + $0x8] sm:$0xf] %v623_v20  ;;  %480 = vmatpush.msrb.mxu0 %v363_v28  ;;  %414 = vmatpush.msra.mxu1 %v373_v33  ;;  %v497_v46 = vld [vmem:[#allocation6 + $0x128] sm:$0xff]  ;;  %v562_v47 = vld [vmem:[#allocation6 + $0x190] sm:$0xff]  ;;  %v563_v48 = vld [vmem:[#allocation6 + $0x198] sm:$0xff] }
  0x1d   : > { %434 = vmatpush.msra.mxu2 %v374_v34  ;;  %462 = vmatpush.msra.mxu3 %v358_v35  ;;  %v494_v49 = vld [vmem:[#allocation6 + $0x110] sm:$0xff]  ;;  %v495_v50 = vld [vmem:[#allocation6 + $0x118] sm:$0xff]  ;;  %v560_v51 = vld [vmem:[#allocation6 + $0x180] sm:$0xff] }
  0x1e   : > { %481 = vmatpush.msrb.mxu0 %v361_v32  ;;  %1138 = vmatpush.msk.msrb.mxu1 %vm392_vm1, %v500_v37  ;;  %v561_v52 = vld [vmem:[#allocation6 + $0x188] sm:$0xff]  ;;  %v492_v53 = vld [vmem:[#allocation6 + $0x100] sm:$0xff]  ;;  %v558_v55 = vld [vmem:[#allocation6 + $0x170] sm:$0xff] }
  0x1f   : > { %1140 = vmatpush.msk.msrb.mxu2 %vm392_vm1, %v501_v38  ;;  %1142 = vmatpush.msk.msrb.mxu3 %vm392_vm1, %v566_v39  ;;  %v493_v54 = vld [vmem:[#allocation6 + $0x108] sm:$0xff]  ;;  %v559_v56 = vld [vmem:[#allocation6 + $0x178] sm:$0xff]  ;;  %v490_v57 = vld [vmem:[#allocation6 + $0xf0] sm:$0xff] }
  0x20   : > { %482 = vmatpush.msrb.mxu0 %v359_v36  ;;  %521 = vmatpush.msrb.mxu1 %v498_v41  ;;  %v491_v58 = vld [vmem:[#allocation6 + $0xf8] sm:$0xff]  ;;  %v556_v59 = vld [vmem:[#allocation6 + $0x160] sm:$0xff]  ;;  %v557_v60 = vld [vmem:[#allocation6 + $0x168] sm:$0xff] }
  0x21   : > { %541 = vmatpush.msrb.mxu2 %v499_v42  ;;  %587 = vmatpush.msrb.mxu3 %v564_v43  ;;  %v488_v61 = vld [vmem:[#allocation6 + $0xe0] sm:$0xff]  ;;  %v489_v62 = vld [vmem:[#allocation6 + $0xe8] sm:$0xff]  ;;  %v554_v63 = vld [vmem:[#allocation6 + $0x150] sm:$0xff] }
  0x22   : > { %1144 = vmatpush.msk.msra.mxu0 %vm392_vm1, %v567_v40  ;;  %522 = vmatpush.msrb.mxu1 %v496_v45  ;;  %v555_v0 = vld [vmem:[#allocation6 + $0x158] sm:$0xff]  ;;  %v747_v10 = vld [vmem:[#allocation2 + $0x10] sm:$0xff]  ;;  %vm848_vm1 = vcmask 519168  }
  0x23   : > { %542 = vmatpush.msrb.mxu2 %v497_v46  ;;  %588 = vmatpush.msrb.mxu3 %v562_v47 }
  0x24   : > { %607 = vmatpush.msra.mxu0 %v565_v44  ;;  %523 = vmatpush.msrb.mxu1 %v494_v49 }
  0x25   : > { %543 = vmatpush.msrb.mxu2 %v495_v50  ;;  %589 = vmatpush.msrb.mxu3 %v560_v51 }
  0x26   : > { %608 = vmatpush.msra.mxu0 %v563_v48  ;;  %524 = vmatpush.msrb.mxu1 %v492_v53 }
  0x27   : > { %544 = vmatpush.msrb.mxu2 %v493_v54  ;;  %590 = vmatpush.msrb.mxu3 %v558_v55 }
  0x28   : > { %609 = vmatpush.msra.mxu0 %v561_v52  ;;  %525 = vmatpush.msrb.mxu1 %v490_v57 }
  0x29   : > { %545 = vmatpush.msrb.mxu2 %v491_v58  ;;  %591 = vmatpush.msrb.mxu3 %v556_v59 }
  0x2a   : > { %610 = vmatpush.msra.mxu0 %v559_v56  ;;  %526 = vmatpush.msrb.mxu1 %v488_v61 }
  0x2b   : > { %546 = vmatpush.msrb.mxu2 %v489_v62  ;;  %592 = vmatpush.msrb.mxu3 %v554_v63  ;;  %v764_v63 = vld [vmem:[%s1434_s5] sm:$0xf] }
  0x2c   : > { %611 = vmatpush.msra.mxu0 %v557_v60  ;;  %755 = vrot.lane.b32.xlu1 %v747_v10, %s1235_s26 }
  0x2d   : > { %736 = vrot.lane.b32.xlu2 %v747_v10, %s1236_s27 }
  0x2e   : > { %612 = vmatpush.msra.mxu0 %v555_v0 }
  0x80   : > { %v321_v1 = vpop.permute.xlu0 %320 }
  0x87   : > { %v737_v29 = vpop.permute.xlu2 %736 }
  0x88   : > { %v326_v5 = vpop.permute.xlu0 %325 }
  0x90   : > { %v352_v2 = vpop.f32.mrf.mxu0 }
  0x91   : > { %v353_v3 = vadd.f32 %v352_v2, %v321_v1 }
  0x93   : > { %1135 = vmatmul.msk.f32.vlgmr.msra.gmra.mxu3 %vm389_vm2, %v353_v3  ;;  %1137 = vmatmul.msk.f32.vlgmr.msrb.gmra.mxu0 %vm389_vm2, %v353_v3  ;;  %v388_v4 = vrot.slane %v353_v3, 4 }
  0x95   : > { %1131 = vmatmul.msk.f32.vlgmr.msra.gmra.mxu1 %vm389_vm2, %v388_v4  ;;  %1133 = vmatmul.msk.f32.vlgmr.msra.gmra.mxu2 %vm389_vm2, %v388_v4 }
  0x98   : > { %v355_v6 = vpop.f32.mrf.mxu0 }
  0x99   : > { %v356_v7 = vadd.f32 %v355_v6, %v326_v5 }
  0x9b   : > { %v568_v8 = vrot.slane %v356_v7, 4 }
  0x9d   : > { %1139 = vmatmul.msk.f32.vlgmr.msrb.gmra.mxu1 %vm389_vm2, %v356_v7  ;;  %1141 = vmatmul.msk.f32.vlgmr.msrb.gmra.mxu2 %vm389_vm2, %v356_v7 }
  0x9e   : > { %1143 = vmatmul.msk.f32.vlgmr.msrb.gmra.mxu3 %vm389_vm2, %v568_v8  ;;  %1145 = vmatmul.msk.f32.vlgmr.msra.gmra.mxu0 %vm389_vm2, %v568_v8  ;;  %v756_v32 = vpop.permute.xlu1 %755  ;;  %vm864_vm2 = vcmask 523268  }
 0x110   : > { %v484_v14 = vpop.f32.mrf.mxu0 }
 0x112   : > { %v416_v11 = vpop.f32.mrf.mxu1 }
 0x116   : > { %v464_v13 = vpop.f32.mrf.mxu3 }
 0x117   : > { %v465_v16 = vadd.f32 %v464_v13, %v416_v11 }
 0x118   : > { %v436_v12 = vpop.f32.mrf.mxu2 }
 0x119   : > { %v485_v17 = vadd.f32 %v484_v14, %v436_v12 }
 0x11a   : > { %v528_v15 = vpop.f32.mrf.mxu1 }
 0x11b   : > { %v551_v18 = vadd.f32 %v528_v15, %v465_v16  ;;  %v614_v22 = vpop.f32.mrf.mxu0 }
 0x120   : > { %v548_v19 = vpop.f32.mrf.mxu2 }
 0x121   : > { %v552_v20 = vadd.f32 %v548_v19, %v485_v17  ;;  %v594_v21 = vpop.f32.mrf.mxu3 }
 0x122   : > { %v617_v23 = vadd.f32 %v594_v21, %v551_v18 }
 0x123   : > { %v618_v24 = vadd.f32 %v614_v22, %v552_v20 }
 0x124   : > { %v630_v25 = vrot.slane %v617_v23, 4 }
 0x125   : > { %v631_v26 = vrot.slane %v618_v24, 4 }
 0x126   : > { %634 = vst [vmem:[#allocation2] sm:$0xf0] %v630_v25 }
 0x127   : > { %635 = vst [vmem:[#allocation2 + $0x8] sm:$0xf0] %v631_v26 }
 0x12d   : > { %v1329_v27 = vld [vmem:[#allocation2] sm:$0xff] }
 0x12e   : > { %751 = vrot.lane.b32.xlu2 %v1329_v27, %s1235_s26  ;;  %732 = vrot.lane.b32.xlu1 %v1329_v27, %s1236_s27  ;;  %v746_v28 = vld [vmem:[#allocation2 + $0x8] sm:$0xff] }
 0x12f   : > { %717 = vrot.lane.b32.xlu0 %v1329_v27, %s1237_s28  ;;  %642 = vst.msk [vmem:[#allocation3 + $0x8] sm:$0xff] %vm641_vm4, %v746_v28 }
 0x136   : > { %753 = vrot.lane.b32.xlu1 %v746_v28, %s1235_s26  ;;  %703 = vrot.lane.b32.xlu2 %v1329_v27, %s1238_s29  ;;  %v766_v0 = vld [vmem:[#allocation3 + $0x8] sm:$0xff] }
 0x137   : > { %719 = vrot.lane.b32.xlu0 %v746_v28, %s1237_s28 }
 0x13e   : > { %705 = vrot.lane.b32.xlu1 %v746_v28, %s1238_s29  ;;  %734 = vrot.lane.b32.xlu2 %v746_v28, %s1236_s27 }
 0x13f   : > { %691 = vrot.lane.b32.xlu0 %v746_v28, %s1239_s30 }
 0x146   : > { %663 = vrot.lane.b32.xlu1 %v746_v28, %s1240_s8  ;;  %677 = vrot.lane.b32.xlu2 %v746_v28, %s1241_s9 }
 0x147   : > { %649 = vrot.lane.b32.xlu0 %v746_v28, %s1242_s11 }
 0x14e   : > { %689 = vrot.lane.b32.xlu1 %v1329_v27, %s1239_s30  ;;  %675 = vrot.lane.b32.xlu2 %v1329_v27, %s1241_s9 }
 0x14f   : > { %661 = vrot.lane.b32.xlu0 %v1329_v27, %s1240_s8 }
 0x156   : > { %647 = vrot.lane.b32.xlu1 %v1329_v27, %s1242_s11 }
 0x188   : > { %v752_v30 = vpop.permute.xlu2 %751 }
 0x190   : > { %v704_v31 = vpop.permute.xlu2 %703 }
 0x198   : > { %v735_v33 = vpop.permute.xlu2 %734 }
 0x199   : > { %v740_v34 = vsel %vm738_vm5, %v735_v33, %v737_v29 }
 0x19a   : > { %744 = vst.msk [vmem:[#allocation3 + $0x78] sm:$0xff] %vm641_vm4, %v740_v34 }
 0x1a0   : > { %v733_v35 = vpop.permute.xlu1 %732  ;;  %v678_v36 = vpop.permute.xlu2 %677 }
 0x1a1   : > { %v739_v37 = vsel %vm738_vm5, %v733_v35, %v735_v33  ;;  %v718_v38 = vpop.permute.xlu0 %717  ;;  %684 = vst.msk [vmem:[#allocation3 + $0x38] sm:$0xff] %vm641_vm4, %v678_v36  ;;  %v780_v50 = vld [vmem:[#allocation3 + $0x78] sm:$0xff] }
 0x1a8   : > { %v754_v39 = vpop.permute.xlu1 %753  ;;  %v676_v40 = vpop.permute.xlu2 %675  ;;  %v772_v56 = vld [vmem:[#allocation3 + $0x38] sm:$0xff] }
 0x1a9   : > { %v758_v41 = vsel %vm757_vm6, %v752_v30, %v754_v39  ;;  %v759_v42 = vsel %vm757_vm6, %v754_v39, %v756_v32  ;;  %v720_v43 = vpop.permute.xlu0 %719  ;;  %v680_v45 = vsel %vm679_vm7, %v676_v40, %v678_v36 }
 0x1aa   : > { %v721_v44 = vsel %vm641_vm4, %v718_v38, %v720_v43  ;;  %794 = vmatpush.msra.mxu1 %v758_v41  ;;  %763 = vst.msk [vmem:[#allocation3 + $0x88] sm:$0xff] %vm641_vm4, %v759_v42 }
 0x1ab   : > { %725 = vst.msk [vmem:[#allocation3 + $0x68] sm:$0xff] %vm641_vm4, %v720_v43 }
 0x1ac   : > { %795 = vmatpush.msra.mxu1 %v739_v37 }
 0x1ae   : > { %796 = vmatpush.msra.mxu1 %v721_v44 }
 0x1b0   : > { %v706_v46 = vpop.permute.xlu1 %705 }
 0x1b1   : > { %v708_v47 = vsel %vm707_vm8, %v704_v31, %v706_v46  ;;  %712 = vst.msk [vmem:[#allocation3 + $0x58] sm:$0xff] %vm641_vm4, %v706_v46  ;;  %v692_v48 = vpop.permute.xlu0 %691  ;;  %v782_v49 = vld [vmem:[#allocation3 + $0x88] sm:$0xff] }
 0x1b2   : > { %797 = vmatpush.msra.mxu1 %v708_v47  ;;  %698 = vst.msk [vmem:[#allocation3 + $0x48] sm:$0xff] %vm641_vm4, %v692_v48  ;;  %814 = vmatpush.msra.mxu2 %v782_v49  ;;  %v778_v51 = vld [vmem:[#allocation3 + $0x68] sm:$0xff] }
 0x1b4   : > { %815 = vmatpush.msra.mxu2 %v780_v50 }
 0x1b6   : > { %816 = vmatpush.msra.mxu2 %v778_v51 }
 0x1b8   : > { %v664_v52 = vpop.permute.xlu1 %663  ;;  %v776_v53 = vld [vmem:[#allocation3 + $0x58] sm:$0xff] }
 0x1b9   : > { %670 = vst.msk [vmem:[#allocation3 + $0x28] sm:$0xff] %vm641_vm4, %v664_v52  ;;  %v650_v54 = vpop.permute.xlu0 %649  ;;  %817 = vmatpush.msra.mxu2 %v776_v53  ;;  %v774_v55 = vld [vmem:[#allocation3 + $0x48] sm:$0xff] }
 0x1ba   : > { %656 = vst.msk [vmem:[#allocation3 + $0x18] sm:$0xff] %vm641_vm4, %v650_v54 }
 0x1bb   : > { %818 = vmatpush.msra.mxu2 %v774_v55 }
 0x1bd   : > { %819 = vmatpush.msra.mxu2 %v772_v56 }
 0x1c0   : > { %v690_v57 = vpop.permute.xlu1 %689  ;;  %v770_v58 = vld [vmem:[#allocation3 + $0x28] sm:$0xff] }
 0x1c1   : > { %v694_v59 = vsel %vm693_vm9, %v690_v57, %v692_v48  ;;  %v662_v60 = vpop.permute.xlu0 %661  ;;  %820 = vmatpush.msra.mxu2 %v770_v58  ;;  %v768_v62 = vld [vmem:[#allocation3 + $0x18] sm:$0xff] }
 0x1c2   : > { %v666_v61 = vsel %vm665_vm10, %v662_v60, %v664_v52  ;;  %798 = vmatpush.msra.mxu1 %v694_v59 }
 0x1c3   : > { %821 = vmatpush.msra.mxu2 %v768_v62 }
 0x1c4   : > { %799 = vmatpush.msra.mxu1 %v680_v45 }
 0x1c5   : > { %822 = vmatpush.msra.mxu2 %v766_v0 }
 0x1c6   : > { %1147 = vmatmul.msk.f32.vlgmr.msra.gmra.mxu2 %vm783_vm11, %v764_v63  ;;  %800 = vmatpush.msra.mxu1 %v666_v61  ;;  %v967_v61 = vld [vmem:[%s1435_s6] sm:$0xf] }
 0x1c8   : > { %v648_v1 = vpop.permute.xlu1 %647 }
 0x1c9   : > { %v652_v2 = vsel %vm651_vm12, %v648_v1, %v650_v54 }
 0x1ca   : > { %801 = vmatpush.msra.mxu1 %v652_v2 }
 0x1cc   : > { %802 = vmatpush.msra.mxu1 %v1329_v27 }
 0x1cd   : > { %1146 = vmatmul.msk.f32.vlgmr.msra.gmra.mxu1 %vm783_vm11, %v764_v63 }
 0x249   : > { %v824_v3 = vpop.f32.mrf.mxu2 }
 0x24a   : > { %v828_v4 = vmax.f32 %v824_v3, 0.0  ;;  %v804_v5 = vpop.f32.mrf.mxu1 }
 0x24b   : > { %v827_v6 = vmax.f32 %v804_v5, 0.0 }
 0x24c   : > { %v831_v7 = vrot.slane %v828_v4, 4 }
 0x24e   : > { %v833_v8 = vsel %vm832_vm13, %v827_v6, %v831_v7 }
 0x24f   : > { %837 = vst.msk [vmem:[#allocation4] sm:$0xff] %vm836_vm15, %v833_v8 }
 0x250   : > { %839 = vst.msk [vmem:[#allocation4 + $0x4] sm:$0xf] %vm838_vm0, %v1234_v9 }
 0x257   : > { %v840_v10 = vld [vmem:[#allocation4] sm:$0xff] }
 0x258   : > { %842 = vst [vmem:[#allocation1] ss:$2 sm:$0xff] %v840_v10 }
 0x25f   : > { %v843_v11 = vld.sshfl [vmem:[#allocation1] sm:$0xff pattern:$0x75316420]  ;;  %v844_v12 = vld.sshfl [vmem:[#allocation1 + $0x8] sm:$0xff pattern:$0x75316420] }
 0x260   : > { %853 = vst [vmem:[#allocation1 + $0x1] ss:$2 sm:$0xff] %v840_v10 }
 0x261   : > { %847 = vst [vmem:[#allocation5] sm:$0xf] %v843_v11 }
 0x262   : > { %849 = vst.msk [vmem:[#allocation5 + $0x8] sm:$0xf] %vm848_vm1, %v844_v12 }
 0x267   : > { %v854_v13 = vld.sshfl [vmem:[#allocation1] sm:$0xff pattern:$0x75316420]  ;;  %v855_v14 = vld.sshfl [vmem:[#allocation1 + $0x8] sm:$0xff pattern:$0x75316420] }
 0x268   : > { %868 = vst [vmem:[#allocation1] ss:$2 sm:$0xff] %v840_v10 }
 0x26f   : > { %v870_v15 = vld.sshfl [vmem:[#allocation1 + $0x8] sm:$0xff pattern:$0x75316420]  ;;  %v869_v16 = vld.sshfl [vmem:[#allocation1] sm:$0xff pattern:$0x75316420] }
 0x270   : > { %873 = vrot.lane.b32.xlu1 %v870_v15, %s1240_s8  ;;  %871 = vrot.lane.b32.xlu0 %v869_v16, %s1240_s8  ;;  %883 = vst [vmem:[#allocation1 + $0x1] ss:$2 sm:$0xff] %v840_v10 }
 0x277   : > { %v884_v9 = vld.sshfl [vmem:[#allocation1] sm:$0xff pattern:$0x75316420]  ;;  %v885_v17 = vld.sshfl [vmem:[#allocation1 + $0x8] sm:$0xff pattern:$0x75316420] }
 0x278   : > { %886 = vrot.lane.b32.xlu2 %v884_v9, %s1241_s9  ;;  %897 = vst [vmem:[#allocation1] ss:$2 sm:$0xff] %v840_v10 }
 0x27f   : > { %v899_v18 = vld.sshfl [vmem:[#allocation1 + $0x8] sm:$0xff pattern:$0x75316420]  ;;  %v898_v19 = vld.sshfl [vmem:[#allocation1] sm:$0xff pattern:$0x75316420] }
 0x280   : > { %902 = vrot.lane.b32.xlu0 %v899_v18, %s1239_s30  ;;  %900 = vrot.lane.b32.xlu2 %v898_v19, %s1239_s30  ;;  %912 = vst [vmem:[#allocation1 + $0x1] ss:$2 sm:$0xff] %v840_v10 }
 0x287   : > { %v914_v20 = vld.sshfl [vmem:[#allocation1 + $0x8] sm:$0xff pattern:$0x75316420]  ;;  %v913_v21 = vld.sshfl [vmem:[#allocation1] sm:$0xff pattern:$0x75316420] }
 0x288   : > { %917 = vrot.lane.b32.xlu2 %v914_v20, %s1238_s29  ;;  %915 = vrot.lane.b32.xlu1 %v913_v21, %s1238_s29  ;;  %926 = vst [vmem:[#allocation1] ss:$2 sm:$0xff] %v840_v10 }
 0x28f   : > { %v928_v22 = vld.sshfl [vmem:[#allocation1 + $0x8] sm:$0xff pattern:$0x75316420]  ;;  %v927_v23 = vld.sshfl [vmem:[#allocation1] sm:$0xff pattern:$0x75316420] }
 0x290   : > { %931 = vrot.lane.b32.xlu2 %v928_v22, %s1237_s28  ;;  %929 = vrot.lane.b32.xlu1 %v927_v23, %s1237_s28  ;;  %941 = vst [vmem:[#allocation1 + $0x1] ss:$2 sm:$0xff] %v840_v10 }
 0x297   : > { %v943_v24 = vld.sshfl [vmem:[#allocation1 + $0x8] sm:$0xff pattern:$0x75316420]  ;;  %v942_v25 = vld.sshfl [vmem:[#allocation1] sm:$0xff pattern:$0x75316420] }
 0x298   : > { %946 = vrot.lane.b32.xlu1 %v943_v24, %s1236_s27  ;;  %944 = vrot.lane.b32.xlu0 %v942_v25, %s1236_s27  ;;  %955 = vst [vmem:[#allocation1] ss:$2 sm:$0xff] %v840_v10 }
 0x29f   : > { %v957_v26 = vld.sshfl [vmem:[#allocation1 + $0x8] sm:$0xff pattern:$0x75316420]  ;;  %v956_v27 = vld.sshfl [vmem:[#allocation1] sm:$0xff pattern:$0x75316420] }
 0x2a0   : > { %856 = vrot.lane.b32.xlu1 %v854_v13, %s1242_s11  ;;  %960 = vrot.lane.b32.xlu0 %v957_v26, %s1235_s26 }
 0x2a1   : > { %958 = vrot.lane.b32.xlu2 %v956_v27, %s1235_s26 }
 0x2a8   : > { %888 = vrot.lane.b32.xlu0 %v885_v17, %s1241_s9 }
 0x2a9   : > { %858 = vrot.lane.b32.xlu2 %v855_v14, %s1242_s11 }
 0x2d2   : > { %v887_v28 = vpop.permute.xlu2 %886 }
 0x2da   : > { %v901_v29 = vpop.permute.xlu2 %900 }
 0x2e2   : > { %v874_v30 = vpop.permute.xlu1 %873  ;;  %v872_v31 = vpop.permute.xlu0 %871 }
 0x2e3   : > { %879 = vst.msk [vmem:[#allocation5 + $0x18] sm:$0xf] %vm848_vm1, %v874_v30  ;;  %v875_v32 = vsel %vm665_vm10, %v872_v31, %v874_v30  ;;  %v918_v33 = vpop.permute.xlu2 %917 }
 0x2e4   : > { %878 = vst [vmem:[#allocation5 + $0x10] sm:$0xf] %v875_v32 }
 0x2e5   : > { %923 = vst.msk [vmem:[#allocation5 + $0x28] sm:$0xf0] %vm864_vm2, %v918_v33 }
 0x2eb   : > { %v932_v34 = vpop.permute.xlu2 %931 }
 0x2ec   : > { %937 = vst.msk [vmem:[#allocation5 + $0x38] sm:$0xf] %vm848_vm1, %v932_v34 }
 0x2f2   : > { %v903_v35 = vpop.permute.xlu0 %902 }
 0x2f3   : > { %v904_v36 = vsel %vm693_vm9, %v901_v29, %v903_v35  ;;  %908 = vst.msk [vmem:[#allocation5 + $0x28] sm:$0xf] %vm848_vm1, %v903_v35 }
 0x2f4   : > { %907 = vst [vmem:[#allocation5 + $0x20] sm:$0xf] %v904_v36 }
 0x2fa   : > { %v916_v37 = vpop.permute.xlu1 %915  ;;  %v973_v56 = vld [vmem:[#allocation5 + $0x28] sm:$0xff] }
 0x2fb   : > { %v919_v38 = vsel %vm707_vm8, %v916_v37, %v918_v33  ;;  %v959_v39 = vpop.permute.xlu2 %958 }
 0x2fc   : > { %922 = vst [vmem:[#allocation5 + $0x20] sm:$0xf0] %v919_v38 }
 0x302   : > { %v930_v40 = vpop.permute.xlu1 %929 }
 0x303   : > { %v933_v41 = vsel %vm641_vm4, %v930_v40, %v932_v34  ;;  %v859_v42 = vpop.permute.xlu2 %858  ;;  %v972_v57 = vld [vmem:[#allocation5 + $0x20] sm:$0xff]  ;;  %vm1035_vm4 = vmor %vm864_vm2, %vm832_vm13 }
 0x304   : > { %936 = vst [vmem:[#allocation5 + $0x30] sm:$0xf] %v933_v41 }
 0x305   : > { %865 = vst.msk [vmem:[#allocation5 + $0x8] sm:$0xf0] %vm864_vm2, %v859_v42 }
 0x30a   : > { %v947_v43 = vpop.permute.xlu1 %946  ;;  %v945_v44 = vpop.permute.xlu0 %944 }
 0x30b   : > { %952 = vst.msk [vmem:[#allocation5 + $0x38] sm:$0xf0] %vm864_vm2, %v947_v43  ;;  %v948_v45 = vsel %vm738_vm5, %v945_v44, %v947_v43 }
 0x30c   : > { %951 = vst [vmem:[#allocation5 + $0x30] sm:$0xf0] %v948_v45  ;;  %v969_v60 = vld [vmem:[#allocation5 + $0x8] sm:$0xff] }
 0x312   : > { %v857_v46 = vpop.permute.xlu1 %856  ;;  %v961_v47 = vpop.permute.xlu0 %960  ;;  %v975_v54 = vld [vmem:[#allocation5 + $0x38] sm:$0xff] }
 0x313   : > { %v860_v48 = vsel %vm651_vm12, %v857_v46, %v859_v42  ;;  %v962_v49 = vsel %vm757_vm6, %v959_v39, %v961_v47  ;;  %966 = vst.msk [vmem:[#allocation5 + $0x48] sm:$0xf] %vm848_vm1, %v961_v47  ;;  %v974_v55 = vld [vmem:[#allocation5 + $0x30] sm:$0xff] }
 0x314   : > { %863 = vst [vmem:[#allocation5] sm:$0xf0] %v860_v48 }
 0x315   : > { %965 = vst [vmem:[#allocation5 + $0x40] sm:$0xf] %v962_v49 }
 0x31a   : > { %v889_v50 = vpop.permute.xlu0 %888  ;;  %v977_v51 = vld [vmem:[#allocation5 + $0x48] sm:$0xf] }
 0x31b   : > { %v890_v52 = vsel %vm679_vm7, %v887_v28, %v889_v50  ;;  %894 = vst.msk [vmem:[#allocation5 + $0x18] sm:$0xf0] %vm864_vm2, %v889_v50  ;;  %1150 = vmatpush.msk.msrb.mxu0 %vm832_vm13, %v977_v51  ;;  %v968_v62 = vld [vmem:[#allocation5] sm:$0xff] }
 0x31c   : > { %893 = vst [vmem:[#allocation5 + $0x10] sm:$0xf0] %v890_v52  ;;  %v976_v53 = vld [vmem:[#allocation5 + $0x40] sm:$0xf] }
 0x31d   : > { %1148 = vmatpush.msk.msra.mxu3 %vm832_vm13, %v976_v53  ;;  %1020 = vmatpush.msrb.mxu0 %v975_v54 }
 0x31f   : > { %1000 = vmatpush.msra.mxu3 %v974_v55  ;;  %1021 = vmatpush.msrb.mxu0 %v973_v56 }
 0x321   : > { %1001 = vmatpush.msra.mxu3 %v972_v57 }
 0x322   : > { %v971_v58 = vld [vmem:[#allocation5 + $0x18] sm:$0xff] }
 0x323   : > { %1022 = vmatpush.msrb.mxu0 %v971_v58  ;;  %v970_v59 = vld [vmem:[#allocation5 + $0x10] sm:$0xff] }
 0x324   : > { %1002 = vmatpush.msra.mxu3 %v970_v59 }
 0x325   : > { %1023 = vmatpush.msrb.mxu0 %v969_v60 }
 0x326   : > { %1003 = vmatpush.msra.mxu3 %v968_v62  ;;  %1151 = vmatmul.msk.f32.vlgmr.msrb.gmra.mxu0 %vm978_vm3, %v967_v61 }
 0x327   : > { %1149 = vmatmul.msk.f32.vlgmr.msra.gmra.mxu3 %vm978_vm3, %v967_v61 }
 0x3a3   : > { %v1025_v63 = vpop.f32.mrf.mxu0 }
 0x3a4   : > { %v1029_v0 = vmax.f32 %v1025_v63, 0.0 }
 0x3a6   : > { %v1032_v1 = vrot.slane %v1029_v0, 4 }
 0x3aa   : > { %v1005_v2 = vpop.f32.mrf.mxu3 }
 0x3ab   : > { %v1028_v3 = vmax.f32 %v1005_v2, 0.0 }
 0x3ad   : > { %v1033_v4 = vsel %vm832_vm13, %v1028_v3, %v1032_v1 }
 0x3ae   : > { %1036 = vst.msk [vmem:[%s312_s18] sm:$0xff] %vm1035_vm4, %v1033_v4 }
 0x3af PF: > { %s18_s24 = sadd.s32 1, %s1228_s24  }
 0x3b0   : > { %p15_p7 = scmp.ge.s32.totalorder %s18_s24, 4  }
 0x3b2   :  { %17 = sbr.rel (!%p15_p7) target bundleno = 1 (0x1), region = 93 }
 0x3b7   :  { %1058 = vsyncpa [#allocation7], 1 }
 0x3b8   :  { %1060 = vsyncpa [#allocation7 + $0x1], 1 }

</bundles_post_ra>
